<compile_context>
chip_gen: v7x
topology: tpu7x:2x2x1
jax: 0.10.0
libtpu: 0.0.40
codegen_flags: <defaults>
</compile_context>

<pallas_src>
import jax
import jax.numpy as jnp
from jax.experimental import pallas as pl
from jax.experimental.pallas import tpu as pltpu


LANE = 128
SUB_TARGET = 512      # (16, 512) f32 slab = 8 vregs; ~5 live slabs fit in vregs
MAX_TS = 16384        # bounds per-step DMA size and inner-loop unroll (<=32)


# ----------------------------------------------------------------------------
# Kernel
# ----------------------------------------------------------------------------
def make_bifpn_kernel(C, sub, n_sub):
    """Kernel closure over the static inner-chunk schedule (sub * n_sub == ts)."""

    def kernel(fw_ref,                      # SMEM (9,) normalized fusion weights
               p1_ref, p2_ref, p3_ref,      # (1, C, ts) channel-major tiles
               w_p2td_ref, b_p2td_ref,      # (Cout, Cin), (C, 1)
               w_p1td_ref, b_p1td_ref,
               w_p2out_ref, b_p2out_ref,
               w_p3out_ref, b_p3out_ref,
               o1_ref, o2_ref, o3_ref):
        # Hoisted once per grid step, reused by every inner chunk.
        f = [fw_ref[i] for i in range(9)]
        w1 = w_p2td_ref[...]
        w2 = w_p1td_ref[...]
        w3 = w_p2out_ref[...]
        w4 = w_p3out_ref[...]
        b1 = jnp.broadcast_to(b_p2td_ref[...], (C, sub))
        b2 = jnp.broadcast_to(b_p1td_ref[...], (C, sub))
        b3 = jnp.broadcast_to(b_p2out_ref[...], (C, sub))
        b4 = jnp.broadcast_to(b_p3out_ref[...], (C, sub))

        # Static loop over lane sub-chunks: big DMA tile, small compute tile.
        # Static slices are zero-cost views; sub divides ts exactly.
        for i in range(n_sub):
            sl = slice(i * sub, (i + 1) * sub)
            p1 = p1_ref[0, :, sl]           # (C, sub), spatial on lanes
            p2 = p2_ref[0, :, sl]
            p3 = p3_ref[0, :, sl]

            # --- top-down path --- (p3_td = p3)
            t = f[0] * p2 + f[1] * p3
            p2_td = jnp.dot(w1, t, preferred_element_type=jnp.float32) + b1
            t = f[2] * p1 + f[3] * p2_td
            p1_td = jnp.dot(w2, t, preferred_element_type=jnp.float32) + b2

            # --- bottom-up path --- (p1_out = p1_td)
            t = f[4] * p2 + f[5] * p2_td + f[6] * p1_td
            p2_out = jnp.dot(w3, t, preferred_element_type=jnp.float32) + b3
            t = f[7] * p3 + f[8] * p2_out
            p3_out = jnp.dot(w4, t, preferred_element_type=jnp.float32) + b4

            o1_ref[0, :, sl] = p1_td.astype(o1_ref.dtype)
            o2_ref[0, :, sl] = p2_out.astype(o2_ref.dtype)
            o3_ref[0, :, sl] = p3_out.astype(o3_ref.dtype)

    return kernel


# ----------------------------------------------------------------------------
# Planning helpers
# ----------------------------------------------------------------------------
def _normalize(w, epsilon):
    w = jnp.maximum(w, 0.0)                 # ReLU
    return w / (jnp.sum(w) + epsilon)       # fast normalized fusion


def _cdiv(a, b):
    return -(-a // b)


def _vmem_capacity_bytes():
    try:
        return int(pltpu.get_tpu_info().vmem_capacity_bytes)
    except Exception:
        return 64 * 1024 * 1024             # conservative: v7x per-core VMEM


def _pick_sub(ts):
    """Largest 128-multiple divisor of ts that is <= SUB_TARGET (or ts itself)."""
    if ts % LANE != 0 or ts <= SUB_TARGET:
        return ts
    ts_l = ts // LANE
    for cand in range(SUB_TARGET // LANE, 0, -1):
        if ts_l % cand == 0:
            return cand * LANE
    return ts


def _plan_tiles(N, S, C, itemsize, max_ts=MAX_TS, vmem_cap=None):
    """Pick (spatial tile ts, inner chunk sub, n_sub, vmem_cap)."""
    if vmem_cap is None:
        vmem_cap = _vmem_capacity_bytes()
    # ~half of the chip's VMEM for the 6 double-buffered pipelined I/O slabs;
    # the rest is headroom for weights, live (C, sub) temporaries and Mosaic
    # internal scratch.
    data_budget = vmem_cap // 2
    bytes_per_lane = 6 * 2 * C * itemsize   # 3 in + 3 out, 2 buffers each
    cap = (data_budget // bytes_per_lane) // SUB_TARGET * SUB_TARGET
    cap = max(LANE, min(cap, max_ts))

    ts = S if S <= cap else cap             # full-dim block always legal

    # Guarantee >= 2 grid steps so both v7x TensorCores get work (no-op v5e/v6e).
    if N * _cdiv(S, ts) < 2 and S >= 2 * LANE:
        ts = max(LANE, _cdiv(_cdiv(S, 2), LANE) * LANE)

    sub = _pick_sub(ts)
    n_sub = ts // sub
    return ts, sub, n_sub, vmem_cap


def _as_1x1(w):
    w = jnp.asarray(w)
    if w.ndim == 4:
        assert w.shape[-2:] == (1, 1), "only the kernel_size=1 path is implemented"
        w = w.reshape(w.shape[0], w.shape[1])
    return w


# ----------------------------------------------------------------------------
# Wrapper
# ----------------------------------------------------------------------------
def bifpn_block(p1, p2, p3, params, epsilon=1e-4, transport_dtype=None,
                max_ts=MAX_TS):
    """p1, p2, p3: (N, C, H, W), identical shapes (no resampling in the module).

    transport_dtype: optional activation-transport dtype (e.g. jnp.bfloat16);
    weights/bias/fusion math and MXU accumulation always stay float32.
    """
    N, C, H, W = p1.shape
    assert p2.shape == p1.shape and p3.shape == p1.shape
    S = H * W

    act_dtype = (jnp.dtype(transport_dtype) if transport_dtype is not None
                 else jnp.dtype(p1.dtype))
    itemsize = act_dtype.itemsize

    ts, sub, n_sub, vmem_cap = _plan_tiles(N, S, C, itemsize, max_ts=max_ts)
    grid = (N, _cdiv(S, ts))                # both axes parallel (megacore/v7x)

    # Free view: NCHW is contiguous in (N, C, H*W); no transpose, no HBM pass
    # (the optional bf16 cast is a single fused convert pass).
    def to_ncs(x):
        x = x.reshape(N, C, S)
        return x if x.dtype == act_dtype else x.astype(act_dtype)

    # normalized scalar fusion weights (tiny glue, plain JAX)
    w1_p1 = _normalize(params["w1_p1"], epsilon)
    w1_p2 = _normalize(params["w1_p2"], epsilon)
    w2_p2 = _normalize(params["w2_p2"], epsilon)
    w2_p3 = _normalize(params["w2_p3"], epsilon)
    # order matches kernel indexing: [w1_p2(2), w1_p1(2), w2_p2(3), w2_p3(2)]
    fw = jnp.concatenate([w1_p2, w1_p1, w2_p2, w2_p3]).astype(jnp.float32)

    def weight(name):
        return _as_1x1(params[name + "_w"]).astype(jnp.float32)

    def bias(name):
        return params[name + "_b"].reshape(C, 1).astype(jnp.float32)

    row_spec = pl.BlockSpec((1, C, ts), lambda n, s: (n, 0, s))
    mat_spec = pl.BlockSpec((C, C), lambda n, s: (0, 0))
    bias_spec = pl.BlockSpec((C, 1), lambda n, s: (0, 0))
    out_sds = jax.ShapeDtypeStruct((N, C, S), act_dtype)

    # VMEM estimate: pipelined I/O slabs + double-buffered weights/biases +
    # live in-kernel (C, sub) f32 temporaries / internal scratch.
    io_bytes = 6 * 2 * C * ts * itemsize
    wgt_bytes = 4 * 2 * (C * C + C) * 4
    tmp_bytes = 8 * C * sub * 4
    vmem_est = io_bytes + wgt_bytes + tmp_bytes
    vmem_limit = int(min(max(int(1.5 * vmem_est), 32 << 20),
                         int(0.9 * vmem_cap)))

    M = N * S
    cost = pl.CostEstimate(flops=8 * M * C * C,
                           transcendentals=0,
                           bytes_accessed=6 * M * C * itemsize + 8 * C * C * 4)

    kernel = make_bifpn_kernel(C, sub, n_sub)

    o1, o2, o3 = pl.pallas_call(
        kernel,
        out_shape=(out_sds, out_sds, out_sds),
        grid_spec=pltpu.PrefetchScalarGridSpec(
            num_scalar_prefetch=0,
            grid=grid,
            in_specs=[
                pl.BlockSpec(memory_space=pltpu.MemorySpace.SMEM),  # fusion wts
                row_spec, row_spec, row_spec,
                mat_spec, bias_spec,
                mat_spec, bias_spec,
                mat_spec, bias_spec,
                mat_spec, bias_spec,
            ],
            out_specs=(row_spec, row_spec, row_spec),
        ),
        compiler_params=pltpu.CompilerParams(
            dimension_semantics=("parallel", "parallel"),
            vmem_limit_bytes=vmem_limit),
        cost_estimate=cost,
    )(fw, to_ncs(p1), to_ncs(p2), to_ncs(p3),
      weight("p2_td"), bias("p2_td"),
      weight("p1_td"), bias("p1_td"),
      weight("p2_out"), bias("p2_out"),
      weight("p3_out"), bias("p3_out"))

    return [o.reshape(N, C, H, W) for o in (o1, o2, o3)]


# ----------------------------------------------------------------------------
# Pure-JAX reference mirroring the PyTorch forward exactly
# ----------------------------------------------------------------------------
def ref_forward(p1, p2, p3, params, epsilon=1e-4):
    w1_p1 = _normalize(params["w1_p1"], epsilon)
    w1_p2 = _normalize(params["w1_p2"], epsilon)
    w2_p2 = _normalize(params["w2_p2"], epsilon)
    w2_p3 = _normalize(params["w2_p3"], epsilon)

    def conv1x1(x, w, b):   # x: NCHW, w: (Cout, Cin), b: (Cout,)
        return jnp.einsum("nchw,oc->nohw", x, w) + b[None, :, None, None]

    p3_td = p3
    p2_td = conv1x1(w1_p2[0] * p2 + w1_p2[1] * p3_td,
                    params["p2_td_w"], params["p2_td_b"])
    p1_td = conv1x1(w1_p1[0] * p1 + w1_p1[1] * p2_td,
                    params["p1_td_w"], params["p1_td_b"])
    p1_out = p1_td
    p2_out = conv1x1(w2_p2[0] * p2 + w2_p2[1] * p2_td + w2_p2[2] * p1_out,
                     params["p2_out_w"], params["p2_out_b"])
    p3_out = conv1x1(w2_p3[0] * p3_td + w2_p3[1] * p2_out,
                     params["p3_out_w"], params["p3_out_b"])
    return [p1_out, p2_out, p3_out]


if __name__ == "__main__":
    C = 16   # in_channels == out_channels (module asserts this)

    key = jax.random.PRNGKey(0)
    keys = jax.random.split(key, 24)

    # deterministic synthetic parameters (shapes per the module __init__)
    params = {
        # Conv(in, out, k=1, pad=0): weight (Cout, Cin, 1, 1) -> stored (Cout, Cin)
        "p1_td_w": 0.1 * jax.random.normal(keys[0], (C, C), jnp.float32),
        "p1_td_b": 0.1 * jax.random.normal(keys[1], (C,), jnp.float32),
        "p2_td_w": 0.1 * jax.random.normal(keys[2], (C, C), jnp.float32),
        "p2_td_b": 0.1 * jax.random.normal(keys[3], (C,), jnp.float32),
        "p2_out_w": 0.1 * jax.random.normal(keys[4], (C, C), jnp.float32),
        "p2_out_b": 0.1 * jax.random.normal(keys[5], (C,), jnp.float32),
        "p3_out_w": 0.1 * jax.random.normal(keys[6], (C, C), jnp.float32),
        "p3_out_b": 0.1 * jax.random.normal(keys[7], (C,), jnp.float32),
        # fusion weights initialized to ones, as in torch.ones(...)
        "w1_p1": jnp.ones((2,), jnp.float32),
        "w1_p2": jnp.ones((2,), jnp.float32),
        "w2_p2": jnp.ones((3,), jnp.float32),
        "w2_p3": jnp.ones((2,), jnp.float32),
    }

    def run_case(N, H, W, k0, k1, k2, transport_dtype=None, rtol=1e-5, atol=1e-5):
        p1_x = jax.random.normal(keys[k0], (N, C, H, W), jnp.float32)
        p2_x = jax.random.normal(keys[k1], (N, C, H, W), jnp.float32)
        p3_x = jax.random.normal(keys[k2], (N, C, H, W), jnp.float32)

        outs = jax.block_until_ready(
            bifpn_block(p1_x, p2_x, p3_x, params, transport_dtype=transport_dtype))
        if transport_dtype is None:
            refs = ref_forward(p1_x, p2_x, p3_x, params)
        else:
            refs = ref_forward(p1_x.astype(transport_dtype),
                               p2_x.astype(transport_dtype),
                               p3_x.astype(transport_dtype), params)
        for o, r in zip(outs, refs):
            assert o.shape == r.shape
            assert jnp.allclose(o.astype(jnp.float32), r.astype(jnp.float32),
                                rtol=rtol, atol=atol), "mismatch vs reference"

    # 1. grid (2, 1): lane-dense full-S tiles, both grid axes parallel.
    run_case(N=2, H=16, W=16, k0=8, k1=9, k2=10)
    # 2. ragged S=272, N=1: forced >=2 spatial tiles (megacore) + masked tail.
    run_case(N=1, H=16, W=17, k0=11, k1=12, k2=13)
    # 3. S=2304, N=1: split tile ts=1152 exercising the inner chunk loop
    #    (sub=384, n_sub=3) and the >=2-grid-steps rule.
    run_case(N=1, H=48, W=48, k0=14, k1=15, k2=16)
    # 4. bf16 activation-transport path (weights / accumulation stay f32).
    run_case(N=2, H=16, W=16, k0=17, k1=18, k2=19,
             transport_dtype=jnp.bfloat16, rtol=2e-2, atol=2e-2)

    print("KERNEL_OK")
</pallas_src>

<mosaic_0001>
module attributes {stable_mosaic.version = 11 : i64} {
  func.func @kernel(%arg0: i32, %arg1: i32, %arg2: memref<9xf32, #tpu.memory_space<smem>>, %arg3: memref<1x16x256xf32, #tpu.memory_space<vmem>>, %arg4: memref<1x16x256xf32, #tpu.memory_space<vmem>>, %arg5: memref<1x16x256xf32, #tpu.memory_space<vmem>>, %arg6: memref<16x16xf32, #tpu.memory_space<vmem>>, %arg7: memref<16x1xf32, #tpu.memory_space<vmem>>, %arg8: memref<16x16xf32, #tpu.memory_space<vmem>>, %arg9: memref<16x1xf32, #tpu.memory_space<vmem>>, %arg10: memref<16x16xf32, #tpu.memory_space<vmem>>, %arg11: memref<16x1xf32, #tpu.memory_space<vmem>>, %arg12: memref<16x16xf32, #tpu.memory_space<vmem>>, %arg13: memref<16x1xf32, #tpu.memory_space<vmem>>, %arg14: memref<1x16x256xf32, #tpu.memory_space<vmem>>, %arg15: memref<1x16x256xf32, #tpu.memory_space<vmem>>, %arg16: memref<1x16x256xf32, #tpu.memory_space<vmem>>) attributes {dimension_semantics = [#tpu.dimension_semantics<parallel>, #tpu.dimension_semantics<parallel>], iteration_bounds = array<i64: 2, 1>, scalar_prefetch = 0 : i64, scratch_operands = 0 : i64, tpu.core_type = #tpu.core_type<tc>, window_params = [{transform_indices = @transform_0, window_bounds = array<i64: 9>}, {transform_indices = @transform_1, window_bounds = array<i64: 1, 16, 256>}, {transform_indices = @transform_2, window_bounds = array<i64: 1, 16, 256>}, {transform_indices = @transform_3, window_bounds = array<i64: 1, 16, 256>}, {pipeline_mode = #tpu.pipeline_mode<synchronous>, transform_indices = @transform_4, window_bounds = array<i64: 16, 16>}, {pipeline_mode = #tpu.pipeline_mode<synchronous>, transform_indices = @transform_5, window_bounds = array<i64: 16, 1>}, {pipeline_mode = #tpu.pipeline_mode<synchronous>, transform_indices = @transform_6, window_bounds = array<i64: 16, 16>}, {pipeline_mode = #tpu.pipeline_mode<synchronous>, transform_indices = @transform_7, window_bounds = array<i64: 16, 1>}, {pipeline_mode = #tpu.pipeline_mode<synchronous>, transform_indices = @transform_8, window_bounds = array<i64: 16, 16>}, {pipeline_mode = #tpu.pipeline_mode<synchronous>, transform_indices = @transform_9, window_bounds = array<i64: 16, 1>}, {pipeline_mode = #tpu.pipeline_mode<synchronous>, transform_indices = @transform_10, window_bounds = array<i64: 16, 16>}, {pipeline_mode = #tpu.pipeline_mode<synchronous>, transform_indices = @transform_11, window_bounds = array<i64: 16, 1>}, {transform_indices = @transform_12, window_bounds = array<i64: 1, 16, 256>}, {transform_indices = @transform_13, window_bounds = array<i64: 1, 16, 256>}, {transform_indices = @transform_14, window_bounds = array<i64: 1, 16, 256>}]} {
    %c0 = arith.constant 0 : index
    %0 = memref.load %arg2[%c0] : memref<9xf32, #tpu.memory_space<smem>>
    %c1 = arith.constant 1 : index
    %1 = memref.load %arg2[%c1] : memref<9xf32, #tpu.memory_space<smem>>
    %c2 = arith.constant 2 : index
    %2 = memref.load %arg2[%c2] : memref<9xf32, #tpu.memory_space<smem>>
    %c3 = arith.constant 3 : index
    %3 = memref.load %arg2[%c3] : memref<9xf32, #tpu.memory_space<smem>>
    %c4 = arith.constant 4 : index
    %4 = memref.load %arg2[%c4] : memref<9xf32, #tpu.memory_space<smem>>
    %c5 = arith.constant 5 : index
    %5 = memref.load %arg2[%c5] : memref<9xf32, #tpu.memory_space<smem>>
    %c6 = arith.constant 6 : index
    %6 = memref.load %arg2[%c6] : memref<9xf32, #tpu.memory_space<smem>>
    %c7 = arith.constant 7 : index
    %7 = memref.load %arg2[%c7] : memref<9xf32, #tpu.memory_space<smem>>
    %c8 = arith.constant 8 : index
    %8 = memref.load %arg2[%c8] : memref<9xf32, #tpu.memory_space<smem>>
    %c0_0 = arith.constant 0 : index
    %c0_1 = arith.constant 0 : index
    %9 = vector.load %arg6[%c0_0, %c0_1] : memref<16x16xf32, #tpu.memory_space<vmem>>, vector<16x16xf32>
    %c0_2 = arith.constant 0 : index
    %c0_3 = arith.constant 0 : index
    %10 = vector.load %arg8[%c0_2, %c0_3] : memref<16x16xf32, #tpu.memory_space<vmem>>, vector<16x16xf32>
    %c0_4 = arith.constant 0 : index
    %c0_5 = arith.constant 0 : index
    %11 = vector.load %arg10[%c0_4, %c0_5] : memref<16x16xf32, #tpu.memory_space<vmem>>, vector<16x16xf32>
    %c0_6 = arith.constant 0 : index
    %c0_7 = arith.constant 0 : index
    %12 = vector.load %arg12[%c0_6, %c0_7] : memref<16x16xf32, #tpu.memory_space<vmem>>, vector<16x16xf32>
    %c0_8 = arith.constant 0 : index
    %c0_9 = arith.constant 0 : index
    %13 = vector.load %arg7[%c0_8, %c0_9] : memref<16x1xf32, #tpu.memory_space<vmem>>, vector<16x1xf32>
    %14 = vector.shape_cast %13 : vector<16x1xf32> to vector<16x1xf32>
    %15 = vector.broadcast %14 : vector<16x1xf32> to vector<16x256xf32>
    %c0_10 = arith.constant 0 : index
    %c0_11 = arith.constant 0 : index
    %16 = vector.load %arg9[%c0_10, %c0_11] : memref<16x1xf32, #tpu.memory_space<vmem>>, vector<16x1xf32>
    %17 = vector.shape_cast %16 : vector<16x1xf32> to vector<16x1xf32>
    %18 = vector.broadcast %17 : vector<16x1xf32> to vector<16x256xf32>
    %c0_12 = arith.constant 0 : index
    %c0_13 = arith.constant 0 : index
    %19 = vector.load %arg11[%c0_12, %c0_13] : memref<16x1xf32, #tpu.memory_space<vmem>>, vector<16x1xf32>
    %20 = vector.shape_cast %19 : vector<16x1xf32> to vector<16x1xf32>
    %21 = vector.broadcast %20 : vector<16x1xf32> to vector<16x256xf32>
    %c0_14 = arith.constant 0 : index
    %c0_15 = arith.constant 0 : index
    %22 = vector.load %arg13[%c0_14, %c0_15] : memref<16x1xf32, #tpu.memory_space<vmem>>, vector<16x1xf32>
    %23 = vector.shape_cast %22 : vector<16x1xf32> to vector<16x1xf32>
    %24 = vector.broadcast %23 : vector<16x1xf32> to vector<16x256xf32>
    %c0_16 = arith.constant 0 : index
    %c0_17 = arith.constant 0 : index
    %c0_18 = arith.constant 0 : index
    %25 = vector.load %arg3[%c0_16, %c0_17, %c0_18] : memref<1x16x256xf32, #tpu.memory_space<vmem>>, vector<1x16x256xf32>
    %26 = vector.shape_cast %25 : vector<1x16x256xf32> to vector<16x256xf32>
    %c0_19 = arith.constant 0 : index
    %c0_20 = arith.constant 0 : index
    %c0_21 = arith.constant 0 : index
    %27 = vector.load %arg4[%c0_19, %c0_20, %c0_21] : memref<1x16x256xf32, #tpu.memory_space<vmem>>, vector<1x16x256xf32>
    %28 = vector.shape_cast %27 : vector<1x16x256xf32> to vector<16x256xf32>
    %c0_22 = arith.constant 0 : index
    %c0_23 = arith.constant 0 : index
    %c0_24 = arith.constant 0 : index
    %29 = vector.load %arg5[%c0_22, %c0_23, %c0_24] : memref<1x16x256xf32, #tpu.memory_space<vmem>>, vector<1x16x256xf32>
    %30 = vector.shape_cast %29 : vector<1x16x256xf32> to vector<16x256xf32>
    %31 = vector.broadcast %0 : f32 to vector<16x256xf32>
    %32 = arith.mulf %31, %28 : vector<16x256xf32>
    %33 = vector.broadcast %1 : f32 to vector<16x256xf32>
    %34 = arith.mulf %33, %30 : vector<16x256xf32>
    %35 = arith.addf %32, %34 : vector<16x256xf32>
    %cst = arith.constant dense<0.000000e+00> : vector<16x256xf32>
    %36 = tpu.matmul %9, %35, %cst {dimension_numbers = #tpu.dot_dimension_numbers<[1], [0], [0], [1], [0, 0, 1, 1], [], []>} : vector<16x16xf32>, vector<16x256xf32>, vector<16x256xf32> -> vector<16x256xf32>
    %37 = arith.addf %36, %15 : vector<16x256xf32>
    %38 = vector.broadcast %2 : f32 to vector<16x256xf32>
    %39 = arith.mulf %38, %26 : vector<16x256xf32>
    %40 = vector.broadcast %3 : f32 to vector<16x256xf32>
    %41 = arith.mulf %40, %37 : vector<16x256xf32>
    %42 = arith.addf %39, %41 : vector<16x256xf32>
    %cst_25 = arith.constant dense<0.000000e+00> : vector<16x256xf32>
    %43 = tpu.matmul %10, %42, %cst_25 {dimension_numbers = #tpu.dot_dimension_numbers<[1], [0], [0], [1], [0, 0, 1, 1], [], []>} : vector<16x16xf32>, vector<16x256xf32>, vector<16x256xf32> -> vector<16x256xf32>
    %44 = arith.addf %43, %18 : vector<16x256xf32>
    %45 = vector.broadcast %4 : f32 to vector<16x256xf32>
    %46 = arith.mulf %45, %28 : vector<16x256xf32>
    %47 = vector.broadcast %5 : f32 to vector<16x256xf32>
    %48 = arith.mulf %47, %37 : vector<16x256xf32>
    %49 = arith.addf %46, %48 : vector<16x256xf32>
    %50 = vector.broadcast %6 : f32 to vector<16x256xf32>
    %51 = arith.mulf %50, %44 : vector<16x256xf32>
    %52 = arith.addf %49, %51 : vector<16x256xf32>
    %cst_26 = arith.constant dense<0.000000e+00> : vector<16x256xf32>
    %53 = tpu.matmul %11, %52, %cst_26 {dimension_numbers = #tpu.dot_dimension_numbers<[1], [0], [0], [1], [0, 0, 1, 1], [], []>} : vector<16x16xf32>, vector<16x256xf32>, vector<16x256xf32> -> vector<16x256xf32>
    %54 = arith.addf %53, %21 : vector<16x256xf32>
    %55 = vector.broadcast %7 : f32 to vector<16x256xf32>
    %56 = arith.mulf %55, %30 : vector<16x256xf32>
    %57 = vector.broadcast %8 : f32 to vector<16x256xf32>
    %58 = arith.mulf %57, %54 : vector<16x256xf32>
    %59 = arith.addf %56, %58 : vector<16x256xf32>
    %cst_27 = arith.constant dense<0.000000e+00> : vector<16x256xf32>
    %60 = tpu.matmul %12, %59, %cst_27 {dimension_numbers = #tpu.dot_dimension_numbers<[1], [0], [0], [1], [0, 0, 1, 1], [], []>} : vector<16x16xf32>, vector<16x256xf32>, vector<16x256xf32> -> vector<16x256xf32>
    %61 = arith.addf %60, %24 : vector<16x256xf32>
    %c0_28 = arith.constant 0 : index
    %c0_29 = arith.constant 0 : index
    %c0_30 = arith.constant 0 : index
    %62 = vector.load %arg14[%c0_28, %c0_29, %c0_30] : memref<1x16x256xf32, #tpu.memory_space<vmem>>, vector<1x16x256xf32>
    %63 = vector.shape_cast %62 : vector<1x16x256xf32> to vector<16x256xf32>
    %64 = vector.shape_cast %44 : vector<16x256xf32> to vector<1x16x256xf32>
    tpu.vector_store %arg14[%c0_28, %c0_29, %c0_30], %64 {strides = array<i32>} : memref<1x16x256xf32, #tpu.memory_space<vmem>>, vector<1x16x256xf32>,
    %c0_31 = arith.constant 0 : index
    %c0_32 = arith.constant 0 : index
    %c0_33 = arith.constant 0 : index
    %65 = vector.load %arg15[%c0_31, %c0_32, %c0_33] : memref<1x16x256xf32, #tpu.memory_space<vmem>>, vector<1x16x256xf32>
    %66 = vector.shape_cast %65 : vector<1x16x256xf32> to vector<16x256xf32>
    %67 = vector.shape_cast %54 : vector<16x256xf32> to vector<1x16x256xf32>
    tpu.vector_store %arg15[%c0_31, %c0_32, %c0_33], %67 {strides = array<i32>} : memref<1x16x256xf32, #tpu.memory_space<vmem>>, vector<1x16x256xf32>,
    %c0_34 = arith.constant 0 : index
    %c0_35 = arith.constant 0 : index
    %c0_36 = arith.constant 0 : index
    %68 = vector.load %arg16[%c0_34, %c0_35, %c0_36] : memref<1x16x256xf32, #tpu.memory_space<vmem>>, vector<1x16x256xf32>
    %69 = vector.shape_cast %68 : vector<1x16x256xf32> to vector<16x256xf32>
    %70 = vector.shape_cast %61 : vector<16x256xf32> to vector<1x16x256xf32>
    tpu.vector_store %arg16[%c0_34, %c0_35, %c0_36], %70 {strides = array<i32>} : memref<1x16x256xf32, #tpu.memory_space<vmem>>, vector<1x16x256xf32>,
    return
  }
  func.func @transform_0(%arg0: i32, %arg1: i32) -> i32 {
    %c0_i32 = arith.constant 0 : i32
    %c0_i32_0 = arith.constant 0 : i32
    return %c0_i32 : i32
  }
  func.func @transform_1(%arg0: i32, %arg1: i32) -> (i32, i32, i32) {
    %c0_i32 = arith.constant 0 : i32
    %c0_i32_0 = arith.constant 0 : i32
    return %arg0, %c0_i32, %arg1 : i32, i32, i32
  }
  func.func @transform_2(%arg0: i32, %arg1: i32) -> (i32, i32, i32) {
    %c0_i32 = arith.constant 0 : i32
    %c0_i32_0 = arith.constant 0 : i32
    return %arg0, %c0_i32, %arg1 : i32, i32, i32
  }
  func.func @transform_3(%arg0: i32, %arg1: i32) -> (i32, i32, i32) {
    %c0_i32 = arith.constant 0 : i32
    %c0_i32_0 = arith.constant 0 : i32
    return %arg0, %c0_i32, %arg1 : i32, i32, i32
  }
  func.func @transform_4(%arg0: i32, %arg1: i32) -> (i32, i32) {
    %c0_i32 = arith.constant 0 : i32
    %c0_i32_0 = arith.constant 0 : i32
    %c0_i32_1 = arith.constant 0 : i32
    return %c0_i32, %c0_i32_0 : i32, i32
  }
  func.func @transform_5(%arg0: i32, %arg1: i32) -> (i32, i32) {
    %c0_i32 = arith.constant 0 : i32
    %c0_i32_0 = arith.constant 0 : i32
    %c0_i32_1 = arith.constant 0 : i32
    return %c0_i32, %c0_i32_0 : i32, i32
  }
  func.func @transform_6(%arg0: i32, %arg1: i32) -> (i32, i32) {
    %c0_i32 = arith.constant 0 : i32
    %c0_i32_0 = arith.constant 0 : i32
    %c0_i32_1 = arith.constant 0 : i32
    return %c0_i32, %c0_i32_0 : i32, i32
  }
  func.func @transform_7(%arg0: i32, %arg1: i32) -> (i32, i32) {
    %c0_i32 = arith.constant 0 : i32
    %c0_i32_0 = arith.constant 0 : i32
    %c0_i32_1 = arith.constant 0 : i32
    return %c0_i32, %c0_i32_0 : i32, i32
  }
  func.func @transform_8(%arg0: i32, %arg1: i32) -> (i32, i32) {
    %c0_i32 = arith.constant 0 : i32
    %c0_i32_0 = arith.constant 0 : i32
    %c0_i32_1 = arith.constant 0 : i32
    return %c0_i32, %c0_i32_0 : i32, i32
  }
  func.func @transform_9(%arg0: i32, %arg1: i32) -> (i32, i32) {
    %c0_i32 = arith.constant 0 : i32
    %c0_i32_0 = arith.constant 0 : i32
    %c0_i32_1 = arith.constant 0 : i32
    return %c0_i32, %c0_i32_0 : i32, i32
  }
  func.func @transform_10(%arg0: i32, %arg1: i32) -> (i32, i32) {
    %c0_i32 = arith.constant 0 : i32
    %c0_i32_0 = arith.constant 0 : i32
    %c0_i32_1 = arith.constant 0 : i32
    return %c0_i32, %c0_i32_0 : i32, i32
  }
  func.func @transform_11(%arg0: i32, %arg1: i32) -> (i32, i32) {
    %c0_i32 = arith.constant 0 : i32
    %c0_i32_0 = arith.constant 0 : i32
    %c0_i32_1 = arith.constant 0 : i32
    return %c0_i32, %c0_i32_0 : i32, i32
  }
  func.func @transform_12(%arg0: i32, %arg1: i32) -> (i32, i32, i32) {
    %c0_i32 = arith.constant 0 : i32
    %c0_i32_0 = arith.constant 0 : i32
    return %arg0, %c0_i32, %arg1 : i32, i32, i32
  }
  func.func @transform_13(%arg0: i32, %arg1: i32) -> (i32, i32, i32) {
    %c0_i32 = arith.constant 0 : i32
    %c0_i32_0 = arith.constant 0 : i32
    return %arg0, %c0_i32, %arg1 : i32, i32, i32
  }
  func.func @transform_14(%arg0: i32, %arg1: i32) -> (i32, i32, i32) {
    %c0_i32 = arith.constant 0 : i32
    %c0_i32_0 = arith.constant 0 : i32
    return %arg0, %c0_i32, %arg1 : i32, i32, i32
  }
}

</mosaic_0001>

<bundles_post_ra>
// kernel: tpu_custom_call.1
= control target key start
LH: loop header
LB: loop body
LE: loop exit
PB: predicated region body
PF: predicated region fallthrough
CT: control target
= control target key end

     0   :  { %s2525_s0 = inlined_call_operand.vmem [shape: f32[9], index: 0, kind: input, shape index: {}]   ;;  %s2526_s1 = inlined_call_operand.vmem [shape: f32[2,16,256], index: 1, kind: input, shape index: {}]   ;;  %s2527_s2 = inlined_call_operand.hbm [shape: f32[2,16,256], index: 2, kind: input, shape index: {}]   ;;  %s2528_s3 = inlined_call_operand.hbm [shape: f32[2,16,256], index: 3, kind: input, shape index: {}]   ;;  %s2529_s4 = inlined_call_operand.vmem [shape: f32[16,16], index: 4, kind: input, shape index: {}]   ;;  %s2530_s5 = inlined_call_operand.vmem [shape: f32[16,1], index: 5, kind: input, shape index: {}]   ;;  %s2531_s6 = inlined_call_operand.hbm [shape: f32[16,16], index: 6, kind: input, shape index: {}]   ;;  %s2532_s7 = inlined_call_operand.vmem [shape: f32[16,1], index: 7, kind: input, shape index: {}]   ;;  %s2533_s8 = inlined_call_operand.vmem [shape: f32[16,16], index: 8, kind: input, shape index: {}]   ;;  %s2534_s9 = inlined_call_operand.vmem [shape: f32[16,1], index: 9, kind: input, shape index: {}]   ;;  %s2535_s10 = inlined_call_operand.hbm [shape: f32[16,16], index: 10, kind: input, shape index: {}]   ;;  %s2536_s11 = inlined_call_operand.vmem [shape: f32[16,1], index: 11, kind: input, shape index: {}]   ;;  %s2537_s12 = inlined_call_operand.hbm [shape: f32[2,16,256], index: 12, kind: output, shape index: {0}]   ;;  %s2538_s13 = inlined_call_operand.hbm [shape: f32[2,16,256], index: 13, kind: output, shape index: {1}]   ;;  %s2539_s14 = inlined_call_operand.hbm [shape: f32[2,16,256], index: 14, kind: output, shape index: {2}]  }
   0x1   :  { %2556 = sst [smem:[#allocation29_spill]] %s2525_s0 }
   0x2   :  { %2557 = sst [smem:[#allocation30_spill]] %s2527_s2 }
   0x3   :  { %2558 = sst [smem:[#allocation31_spill]] %s2531_s6 }
   0x4   :  { %2559 = sst [smem:[#allocation32_spill]] %s2535_s10 }
   0x5   :  { %2560 = sst [smem:[#allocation33_spill]] %s2537_s12 }
   0x6   :  { %2561 = sst [smem:[#allocation34_spill]] %s2538_s13 }
   0x7   :  { %2562 = sst [smem:[#allocation35_spill]] %s2539_s14 }
   0x8   :  { %20 = vsyncpa [#allocation5], 0 }
   0x9   :  { %21 = vsyncpa [#allocation3], 0 }
   0xa   :  { %23 = vsyncpa [#allocation3 + $0x1], 0 }
   0xb   :  { %24 = vsyncpa [#allocation8], 0 }
   0xc   :  { %26 = vsyncpa [#allocation8 + $0x1], 0 }
   0xd   :  { %27 = vsyncpa [#allocation11], 0 }
   0xe   :  { %28 = vsyncpa [#allocation4], 0 }
   0xf   :  { %30 = vsyncpa [#allocation4 + $0x1], 0 }
  0x10   :  { %31 = vsyncpa [#allocation14], 0 }
  0x11   :  { %33 = vsyncpa [#allocation14 + $0x1], 0  ;;  %s2005_s29 = smov 0   ;;  %s2007_s30 = smov 0  }
  0x12   :  { %s2009_s15 = smov 0   ;;  %s2011_s16 = smov 0  }
  0x13   :  { %s2013_s17 = smov 0   ;;  %s2015_s18 = smov 0  }
  0x14 LB: > { %2563 = sst [smem:[#allocation23_spill]] %s1892_s29  ;;  %s2036_s19 = sadd.s32 4294967295, %s1912_s18   ;;  %s1912_s18 = sphi %s2015_s18, %s39_s18   ;;  %s1908_s17 = sphi %s2013_s17, %s2609_s17   ;;  %s1904_s16 = sphi %s2011_s16, %s2608_s16   ;;  %s1900_s15 = sphi %s2009_s15, %s2604_s15   ;;  %s1896_s30 = sphi %s2007_s30, %s2607_s30   ;;  %s1892_s29 = sphi %s2005_s29, %s2606_s29  }
  0x15   : > { %2564 = sst [smem:[#allocation24_spill]] %s1900_s15  ;;  %s2540_s20 = sadd.s32 4294967294, %s1912_s18  }
  0x16   : > { %p122_p0 = scmp.ne.s32.totalorder %s1896_s30, %s1892_s29  ;;  %p2546_p1 = scmp.eq.s32.totalorder %s2036_s19, 0 }
  0x17   : > { %p350_p3 = scmp.eq.s32.totalorder %s2540_s20, 1  ;;  %p1434_p5 = scmp.ge.s32.totalorder %s1912_s18, 1 }
  0x18   : > { %p2047_p4 = por %p2546_p1, %p122_p0  ;;  %p413_p7 = scmp.lt.s32.totalorder %s1912_s18, 3 }
  0x19   : > { %p2052_p6 = por %p350_p3, %p122_p0  ;;  %s1914_s24 = smov [#allocation9]  }
  0x1a   : > { %s2565_s21 = scalar_select %p2047_p4, 1, 0 }
  0x1b   : > { %s2566_s22 = scalar_select %p2052_p6, 1, 0 }
  0x1c   : > { %p2057_p8 = pnand %p1434_p5, %p413_p7  ;;  %s442_s25 = sshll.u32 %s1914_s24, 4  ;;  %s443_s25 = int_to_ptr.vmem [resolvable:$true] %s442_s25 }
  0x1d   : > { %2567 = sst [smem:[#allocation25_spill]] %s2566_s22  ;;  %s2570_s0 = sld [smem:[#allocation29_spill]] }
  0x1e   : > { %s2568_s23 = scalar_select %p2057_p8, 1, 0 }
  0x1f   : > { %p1527_p9 = pneg %p2057_p8  ;;  %s2571_s6 = sld [smem:[#allocation31_spill]] }
  0x21   : > { %p2066_p11 = pnand %p1527_p9, %p2546_p1 }
  0x23   : > { %s426_s20 = sshll.u32 %s2570_s0, 4  ;;  %p2083_p13 = pneg %p2066_p11  ;;  %s2073_s20 = int_to_ptr.vmem [resolvable:$true] %s426_s20 }
  0x25   : > { %s1623_s24 = scalar_lea.hbm %s2571_s6, 256 }
  0x26   : > { %p1624_p12 = scmp.ne.s32.totalorder %s2571_s6, %s1623_s24  ;;  %p1630_p5 = scmp.lt.u32.totalorder %s1623_s24, %s2571_s6 }
  0x28   : > { %p1626_p0 = pnand %p2083_p13, %p1624_p12 }
  0x2a   : > { %p1627_p3 = pneg %p1626_p0 }
  0x2c   : > { %p1632_p7 = pnand %p1630_p5, %p1627_p3 }
  0x2e   : > { %1635 = shalt.err (!%p1632_p7)
}
  0x2f   : > { %s1636_s29 = scalar_lea.vmem %s443_s25, 256  ;;  %p1644_p2 = scmp.lt.s32.totalorder %s443_s25, %s443_s25 }
  0x30   : > { %p1637_p9 = scmp.ne.s32.totalorder %s443_s25, %s1636_s29  ;;  %p1645_p6 = scmp.lt.s32.totalorder %s1636_s29, %s1636_s29 }
  0x32   : > { %p1639_p10 = pnand %p1637_p9, %p2083_p13  ;;  %p1646_p4 = por %p1645_p6, %p1644_p2 }
  0x34   : > { %p1640_p1 = pneg %p1639_p10 }
  0x36   : > { %p1647_p8 = pnand %p1646_p4, %p1640_p1 }
  0x38   : > { %1650 = shalt.err (!%p1647_p8)
}
  0x39   : > { %s2549_s12 = smov 128   ;;  %s2550_s14 = smov 8  }
  0x3a   : > { %1533 = dma.hbm_to_vmem [thread:$0]  (!%p2066_p11), %s2571_s6, 256, %s443_s25, [#allocation8], %s2549_s12, %s2549_s12, %s2550_s14  }
  0x3b   : > { %s1651_s27 = scalar_lea.vmem %s2073_s20, 16  ;;  %p1659_p4 = scmp.lt.s32.totalorder %s2073_s20, %s2073_s20 }
  0x3c   : > { %p1652_p10 = scmp.ne.s32.totalorder %s2073_s20, %s1651_s27  ;;  %p1660_p6 = scmp.lt.s32.totalorder %s1651_s27, %s1651_s27 }
  0x3e   : > { %p1654_p1 = pnand %p1652_p10, %p2083_p13  ;;  %p1661_p8 = por %p1660_p6, %p1659_p4 }
  0x40   : > { %p1655_p2 = pneg %p1654_p1 }
  0x42   : > { %p1662_p12 = pnand %p1661_p8, %p1655_p2 }
  0x44   : > { %1665 = shalt.err (!%p1662_p12)
}
  0x45   : > { %s1917_s28 = smov [#allocation2]   ;;  %s1918_s29 = smov [#allocation10]  }
  0x46   : > { %1530 = dma.vmem_to_smem (!%p2066_p11), %s2073_s20, 16, %s1917_s28, [#allocation5]  }
  0x47   : > { %s464_s22 = sshll.u32 %s1918_s29, 4  ;;  %s2573_s10 = sld [smem:[#allocation32_spill]]  ;;  %s465_s22 = int_to_ptr.vmem [resolvable:$true] %s464_s22 }
  0x4d   : > { %s1666_s12 = scalar_lea.hbm %s2573_s10, 256 }
  0x4e   : > { %p1667_p0 = scmp.ne.s32.totalorder %s2573_s10, %s1666_s12  ;;  %p1673_p7 = scmp.lt.u32.totalorder %s1666_s12, %s2573_s10 }
  0x50   : > { %p1669_p3 = pnand %p1667_p0, %p2083_p13 }
  0x52   : > { %p1670_p5 = pneg %p1669_p3 }
  0x54   : > { %p1675_p9 = pnand %p1673_p7, %p1670_p5 }
  0x56   : > { %1678 = shalt.err (!%p1675_p9)
}
  0x57   : > { %s1679_s20 = scalar_lea.vmem %s465_s22, 256  ;;  %p1687_p4 = scmp.lt.s32.totalorder %s465_s22, %s465_s22 }
  0x58   : > { %p1680_p10 = scmp.ne.s32.totalorder %s465_s22, %s1679_s20  ;;  %p1688_p6 = scmp.lt.s32.totalorder %s1679_s20, %s1679_s20 }
  0x5a   : > { %p1682_p1 = pnand %p1680_p10, %p2083_p13  ;;  %p1689_p8 = por %p1688_p6, %p1687_p4 }
  0x5c   : > { %p1683_p2 = pneg %p1682_p1 }
  0x5e   : > { %p1690_p12 = pnand %p1689_p8, %p1683_p2 }
  0x60   : > { %1693 = shalt.err (!%p1690_p12)
}
  0x61   : > { %s2574_s0 = smov 8   ;;  %s2575_s14 = smov 128  }
  0x62   : > { %1536 = dma.hbm_to_vmem [thread:$0]  (!%p2066_p11), %s2573_s10, 256, %s465_s22, [#allocation11], %s2575_s14, %s2575_s14, %s2574_s0  }
  0x63   : > { %s51_s13 = sadd.s32 1, %s1908_s17  ;;  %s109_s26 = sadd.s32 1, %s1900_s15 }
  0x64   : > { %p53_p13 = scmp.ge.s32.totalorder %s51_s13, 2  ;;  %p116_p0 = scmp.ne.s32.totalorder %s1900_s15, %s1896_s30 }
  0x65   : > { %p117_p3 = scmp.eq.s32.totalorder %s1912_s18, 0  ;;  %p2578_p7 = scmp.eq.s32.totalorder %s2036_s19, 1 }
  0x66   : > { %s2611_s13 = smov (%p53_p13, %s51_s13), 0  ;;  %p1557_p11 = scmp.lt.s32.totalorder %s1912_s18, 2 }
  0x67   : > { %2576 = sst [smem:[#allocation26_spill]] %s2611_s13  ;;  %p2139_p5 = por %p117_p3, %p116_p0 }
  0x68   : > { %p2145_p9 = por %p2578_p7, %p116_p0  ;;  %s104_s22 = ssub.s32 %s1908_s17, %s2611_s13 }
  0x69   : > { %p107_p10 = scmp.eq.s32.totalorder %s104_s22, 0  ;;  %s494_s25 = sand.u32 1, %s1900_s15  }
  0x6a   : > { %s2579_s29 = scalar_select %p2145_p9, 1, 0 }
  0x6b   : > { %s2153_s24 = sshll.u32 %s494_s25, 5  ;;  %s2551_s20 = sshll.u32 %s1908_s17, 9 }
  0x6c   : > { %2580 = sst [smem:[#allocation27_spill]] %s2579_s29  ;;  %s2582_s2 = sld [smem:[#allocation30_spill]] }
  0x6d   : > { %s2156_s27 = scalar_select %p107_p10, %s1900_s15, %s109_s26  }
  0x6e   : > { %s498_s12 = scalar_lea.vmem [#allocation6], %s2153_s24  ;;  %p2171_p1 = pnand %p1557_p11, %p2139_p5 }
  0x6f   : > { %2581 = sst [smem:[#allocation28_spill]] %s2156_s27  ;;  %s507_s10 = sshll.u32 %s498_s12, 4  ;;  %s2167_s10 = int_to_ptr.vmem [resolvable:$true] %s507_s10 }
  0x70   : > { %s2175_s26 = scalar_lea.sflag [#allocation3], %s494_s25  ;;  %p1696_p4 = pneg %p2171_p1 }
  0x72   : > { %s2164_s6 = scalar_lea.hbm %s2582_s2, %s2551_s20  ;;  %s1699_s28 = scalar_lea.hbm %s2582_s2, 1024 }
  0x73   : > { %s1694_s0 = scalar_lea.hbm %s2164_s6, 512  ;;  %p1700_p12 = scmp.lt.u32.totalorder %s2164_s6, %s2582_s2 }
  0x74   : > { %p1695_p2 = scmp.ne.s32.totalorder %s2164_s6, %s1694_s0  ;;  %p1701_p13 = scmp.lt.u32.totalorder %s1699_s28, %s1694_s0 }
  0x75   : > { %p1703_p3 = scmp.lt.u32.totalorder %s1694_s0, %s2164_s6 }
  0x76   : > { %p1697_p6 = pnand %p1696_p4, %p1695_p2  ;;  %p1702_p0 = por %p1701_p13, %p1700_p12 }
  0x78   : > { %p1698_p8 = pneg %p1697_p6  ;;  %p1704_p5 = por %p1703_p3, %p1702_p0 }
  0x7a   : > { %p1705_p7 = pnand %p1704_p5, %p1698_p8 }
  0x7c   : > { %1708 = shalt.err (!%p1705_p7)
}
  0x7d   : > { %s1709_s25 = scalar_lea.vmem %s2167_s10, 512  ;;  %s1919_s14 = smov [#allocation6]  }
  0x7e   : > { %p1710_p11 = scmp.ne.s32.totalorder %s2167_s10, %s1709_s25  ;;  %s1714_s12 = sshll.u32 %s1919_s14, 4  ;;  %s1715_s12 = int_to_ptr.vmem [resolvable:$false] %s1714_s12 }
  0x7f   : > { %s1716_s13 = scalar_lea.vmem %s1715_s12, 1024  ;;  %p1717_p6 = scmp.lt.s32.totalorder %s2167_s10, %s1715_s12 }
  0x80   : > { %p1712_p10 = pnand %p1710_p11, %p1696_p4  ;;  %p1718_p12 = scmp.lt.s32.totalorder %s1716_s13, %s1709_s25 }
  0x82   : > { %p1713_p2 = pneg %p1712_p10  ;;  %p1719_p13 = por %p1718_p12, %p1717_p6 }
  0x84   : > { %p1720_p0 = pnand %p1719_p13, %p1713_p2 }
  0x86   : > { %1723 = shalt.err (!%p1720_p0)
}
  0x87   : > { %s1920_s20 = smov 256   ;;  %s1921_s0 = smov 16  }
  0x88   : > { %1540 = dma.hbm_to_vmem [thread:$0]  (!%p2171_p1), %s2164_s6, 512, %s2167_s10, %s2175_s26, %s1920_s20, %s1920_s20, %s1921_s0  }
  0x89   : > { %s2584_s28 = sshll.u32 %s1908_s17, 9  ;;  %s521_s13 = scalar_lea.vmem [#allocation7], %s2153_s24 }
  0x8a   : > { %s2211_s12 = scalar_lea.hbm %s2528_s3, %s2584_s28  ;;  %s530_s2 = sshll.u32 %s521_s13, 4  ;;  %s2214_s2 = int_to_ptr.vmem [resolvable:$true] %s530_s2 }
  0x8b   : > { %s517_s27 = sand.u32 1, %s1912_s18   ;;  %s1724_s29 = scalar_lea.hbm %s2211_s12, 512 }
  0x8c   : > { %s2217_s15 = scalar_lea.sflag [#allocation8], %s517_s27  ;;  %p1725_p8 = scmp.ne.s32.totalorder %s2211_s12, %s1724_s29 }
  0x8d   : > { %s1729_s26 = scalar_lea.hbm %s2528_s3, 1024  ;;  %p1730_p7 = scmp.lt.u32.totalorder %s2211_s12, %s2528_s3 }
  0x8e   : > { %p1727_p3 = pnand %p1725_p8, %p1696_p4  ;;  %p1731_p11 = scmp.lt.u32.totalorder %s1729_s26, %s1724_s29 }
  0x8f   : > { %p1733_p2 = scmp.lt.u32.totalorder %s1724_s29, %s2211_s12 }
  0x90   : > { %p1728_p5 = pneg %p1727_p3  ;;  %p1732_p10 = por %p1731_p11, %p1730_p7 }
  0x92   : > { %p1734_p6 = por %p1733_p2, %p1732_p10 }
  0x94   : > { %p1735_p12 = pnand %p1734_p6, %p1728_p5 }
  0x96   : > { %1738 = shalt.err (!%p1735_p12)
}
  0x97   : > { %s1739_s24 = scalar_lea.vmem %s2214_s2, 512  ;;  %s1922_s27 = smov [#allocation7]  }
  0x98   : > { %p1740_p13 = scmp.ne.s32.totalorder %s2214_s2, %s1739_s24  ;;  %s1744_s14 = sshll.u32 %s1922_s27, 4  ;;  %s1745_s14 = int_to_ptr.vmem [resolvable:$false] %s1744_s14 }
  0x99   : > { %s1746_s13 = scalar_lea.vmem %s1745_s14, 1024  ;;  %p1747_p3 = scmp.lt.s32.totalorder %s2214_s2, %s1745_s14 }
  0x9a   : > { %p1742_p0 = pnand %p1740_p13, %p1696_p4  ;;  %p1748_p7 = scmp.lt.s32.totalorder %s1746_s13, %s1739_s24 }
  0x9c   : > { %p1743_p8 = pneg %p1742_p0  ;;  %p1749_p11 = por %p1748_p7, %p1747_p3 }
  0x9e   : > { %p1750_p10 = pnand %p1749_p11, %p1743_p8 }
  0xa0   : > { %1753 = shalt.err (!%p1750_p10)
}
  0xa1   : > { %1543 = dma.hbm_to_vmem [thread:$0]  (!%p2171_p1), %s2211_s12, 512, %s2214_s2, %s2217_s15, %s1920_s20, %s1920_s20, %s1921_s0  }
  0xa2   : > { %p2585_p4 = scmp.ne.s32.totalorder %s2568_s23, 0 }
  0xa3   : > { %p2586_p5 = scmp.eq.s32.totalorder (!%p2585_p4), %s2036_s19, 0 }
  0xa4   : > { %542 = sbr.rel (%p2585_p4) target bundleno = 1124 (0x464), region = 68 }
  0xab   : > { %1863 = dma.done.wait (%p2586_p5), [#allocation5], 16   ;;  %p2587_p2 = pmov %p2586_p5 }
  0xac   : > { %s2253_s29 = sand.u32 1, %s1896_s30   ;;  %p2588_p1 = scmp.ne.s32.totalorder %s2565_s21, 0 }
  0xad   : > { %1865 = vsyncadd (%p2587_p2), [#allocation5], 4294967280  ;;  %s2256_s22 = sshll.u32 %s2253_s29, 5  ;;  %s549_s10 = scalar_lea.sflag [#allocation3], %s2253_s29 }
  0xae   : > { %s552_s2 = scalar_lea.vmem [#allocation6], %s2256_s22 }
  0xaf   : > { %1867 = dma.done.wait (%p2588_p1), %s549_s10, 512  }
  0xb0   : > { %1869 = vsyncadd (%p2588_p1), %s549_s10, 4294966784  ;;  %s557_s15 = sand.u32 1, %s2036_s19   ;;  %s2268_s20 = scalar_lea.vmem [#allocation7], %s2256_s22 }
  0xb1   : > { %s558_s23 = scalar_lea.sflag [#allocation8], %s557_s15 }
  0xb2   : > { %1871 = dma.done.wait (%p2588_p1), %s558_s23, 512  }
  0xb3   : > { %1873 = vsyncadd (%p2588_p1), %s558_s23, 4294966784  ;;  %p2589_p6 = pmov %p2587_p2 }
  0xb4   : > { %p2590_p12 = pmov %p2587_p2 }
  0xb5   : > { %1875 = dma.done.wait (%p2589_p6), [#allocation8], 256  }
  0xb6   : > { %1877 = vsyncadd (%p2590_p12), [#allocation8], 4294967040  ;;  %p2591_p13 = pmov %p2587_p2 }
  0xb7   : > { %p2592_p0 = pmov %p2587_p2 }
  0xb8   : > { %1879 = dma.done.wait (%p2591_p13), [#allocation11], 256  }
  0xb9   : > { %1881 = vsyncadd (%p2592_p0), [#allocation11], 4294967040 }
  0xba   : > { %574 = sfence }
  0xbb   : > { %s654_s0 = sld [smem:[#allocation2]]  ;;  %s1456_s12 = sld [smem:[#allocation2 + $0x1]]  ;;  %v2282_v0 = vld [vmem:[%s552_s2 + $0x8] sm:$0xff]  ;;  %v2284_v1 = vld [vmem:[%s552_s2 + $0x18] sm:$0xff]  ;;  %v1923_v2 = vmov 0.0   ;;  %v1924_v3 = vmov 0  }
  0xbc   : > { %816 = vmatprep.mubr.f32.mxu0 %v1923_v2  ;;  %1621 = vset.pattern.permute.xlu0 %v1924_v3  ;;  %v2288_v4 = vld [vmem:[%s2268_s20 + $0x8] sm:$0xff]  ;;  %v2291_v5 = vld [vmem:[%s2268_s20 + $0x18] sm:$0xff]  ;;  %v671_v6 = vld [vmem:[%s2530_s5] sm:$0xff]  ;;  %vm745_vm0 = vcmask 130048   ;;  %p640_p8 = scmp.lt.s32.totalorder %s1904_s16, 1  ;;  %s1459_s24 = sld [smem:[#allocation2 + $0x4]] }
  0xbd   : > { %913 = vmatprep.mubr.f32.mxu1 %v1923_v2  ;;  %1622 = vset.pattern.permute.xlu1 %v1924_v3  ;;  %v2297_v7 = vld [vmem:[%s552_s2] sm:$0xff]  ;;  %v2299_v8 = vld [vmem:[%s552_s2 + $0x10] sm:$0xff]  ;;  %v672_v11 = vld [vmem:[%s2530_s5 + $0x8] sm:$0xff]  ;;  %s1460_s14 = sld [smem:[#allocation2 + $0x5]]  ;;  %s1457_s13 = sld [smem:[#allocation2 + $0x2]] }
  0xbe   : > { %675 = vperm.xlu0 %1621, %v671_v6   ;;  %v2309_v16 = vld [vmem:[%s2268_s20] sm:$0xff]  ;;  %v2312_v17 = vld [vmem:[%s2268_s20 + $0x10] sm:$0xff]  ;;  %v664_v31 = vld [vmem:[%s2529_s4 + $0x8] sm:$0xff]  ;;  %s641_s27 = scalar_select %p640_p8, %s1904_s16, 1 }
  0xbf   : > { %v695_v24 = vld [vmem:[%s2534_s9] sm:$0xff]  ;;  %v684_v33 = vld [vmem:[%s2532_s7 + $0x8] sm:$0xff]  ;;  %s1458_s10 = sld [smem:[#allocation2 + $0x3]]  ;;  %s2360_s21 = scalar_lea.vmem [#allocation12], %s2256_s22 }
  0xc0   : > { %v707_v29 = vld [vmem:[%s2536_s11] sm:$0xff]  ;;  %v696_v34 = vld [vmem:[%s2534_s9 + $0x8] sm:$0xff]  ;;  %s1485_s2 = sshll.u32 %s641_s27, 5  ;;  %s1463_s27 = sld [smem:[#allocation2 + $0x8]] }
  0xc1   : > { %v731_v9 = vstv %s654_s0  ;;  %v736_v10 = vstv %s1456_s12  ;;  %v663_v30 = vld [vmem:[%s2529_s4] sm:$0xff]  ;;  %v708_v35 = vld [vmem:[%s2536_s11 + $0x8] sm:$0xff]  ;;  %s647_s0 = scalar_lea.vmem %s2526_s1, %s1485_s2  ;;  %s1461_s12 = sld [smem:[#allocation2 + $0x6]] }
  0xc2   : > { %v733_v12 = vmul.f32 %v731_v9, %v2282_v0  ;;  %v735_v13 = vmul.f32 %v731_v9, %v2284_v1  ;;  %v738_v14 = vmul.f32 %v736_v10, %v2288_v4  ;;  %v740_v15 = vmul.f32 %v736_v10, %v2291_v5  ;;  %680 = vperm.xlu0 %1621, %v672_v11   ;;  %v683_v32 = vld [vmem:[%s2532_s7] sm:$0xff]  ;;  %v720_v47 = vld [vmem:[%s647_s0 + $0x8] sm:$0xff]  ;;  %v721_v48 = vld [vmem:[%s647_s0 + $0x10] sm:$0xff]  ;;  %s2396_s23 = sshll.u32 %s1904_s16, 9  ;;  %s2406_s26 = scalar_lea.sflag [#allocation14], %s557_s15 }
  0xc3   : > { %v732_v18 = vmul.f32 %v731_v9, %v2297_v7  ;;  %v734_v19 = vmul.f32 %v731_v9, %v2299_v8  ;;  %v737_v22 = vmul.f32 %v736_v10, %v2309_v16  ;;  %v739_v23 = vmul.f32 %v736_v10, %v2312_v17  ;;  %687 = vperm.xlu1 %1622, %v683_v32   ;;  %v719_v43 = vld [vmem:[%s647_s0] sm:$0xff]  ;;  %v722_v49 = vld [vmem:[%s647_s0 + $0x18] sm:$0xff]  ;;  %s1925_s28 = smov [#allocation13]  }
  0xc4   : > { %v742_v20 = vadd.f32 %v738_v14, %v733_v12  ;;  %v744_v21 = vadd.f32 %v740_v15, %v735_v13  ;;  %v926_v37 = vstv %s1459_s24  ;;  %v931_v40 = vstv %s1460_s14  ;;  %v665_v15 = vld [vmem:[#allocation9] sm:$0xff]  ;;  %s1462_s24 = sld [smem:[#allocation2 + $0x7]]  ;;  %s2377_s14 = scalar_lea.vmem [#allocation13], %s2256_s22 }
  0xc5   : > { %v741_v26 = vadd.f32 %v737_v22, %v732_v18  ;;  %v743_v27 = vadd.f32 %v739_v23, %v734_v19  ;;  %v829_v42 = vstv %s1457_s13  ;;  %v928_v44 = vmul.f32 %v926_v37, %v2282_v0  ;;  %v666_v18 = vld [vmem:[#allocation9 + $0x8] sm:$0xff]  ;;  %s1185_s2 = sshll.u32 %s2377_s14, 4  ;;  %s1758_s25 = sshll.u32 %s1925_s28, 4  ;;  %s2393_s2 = int_to_ptr.vmem [resolvable:$true] %s1185_s2  ;;  %s1759_s25 = int_to_ptr.vmem [resolvable:$false] %s1758_s25 }
  0xc6   : > { %v1489_v25 = vpack.c.bf16 %v744_v21, %v742_v20  ;;  %699 = vperm.xlu0 %1621, %v695_v24   ;;  %v834_v45 = vstv %s1458_s10  ;;  %v930_v50 = vmul.f32 %v926_v37, %v2284_v1  ;;  %v830_v54 = vmul.f32 %v829_v42, %v719_v43  ;;  %s1167_s10 = sshll.u32 %s2360_s21, 4  ;;  %p1761_p10 = scmp.lt.s32.totalorder %s2393_s2, %s1759_s25  ;;  %s2391_s10 = int_to_ptr.vmem [resolvable:$true] %s1167_s10 }
  0xc7   : > { %v1491_v28 = vpack.c.bf16 %v743_v27, %v741_v26  ;;  %692 = vperm.xlu1 %1622, %v684_v33   ;;  %v831_v58 = vmul.f32 %v829_v42, %v720_v47  ;;  %v832_v59 = vmul.f32 %v829_v42, %v721_v48  ;;  %v833_v63 = vmul.f32 %v829_v42, %v722_v49 }
  0xc8   : > { %1490 = vmatprep.subr.bf16.mxu0 %v1489_v25  ;;  %v927_v20 = vmul.f32 %v926_v37, %v2297_v7  ;;  %v940_v23 = vstv %s1461_s12  ;;  %s2594_s12 = sld [smem:[#allocation34_spill]] }
  0xc9   : > { %1492 = vmatpush1.bf16.msra.mxu0 %v1491_v28  ;;  %v929_v28 = vmul.f32 %v926_v37, %v2299_v8 }
  0xca   : > { %711 = vperm.xlu0 %1621, %v707_v29  }
  0xcb   : > { %704 = vperm.xlu1 %1622, %v696_v34  }
  0xcc   : > { %1464 = vmatmul.mubr.msk.f32.vlgmr.msra.gmra.mrb[0].mxu0 %vm745_vm0, %v663_v30 }
  0xcd   : > { %822 = vmatprep.mubr.f32.mxu0 %v1923_v2 }
  0xce   : > { %s2402_s6 = scalar_lea.hbm %s2594_s12, %s2396_s23 }
  0xcf   : > { %716 = vperm.xlu1 %1622, %v708_v35  }
  0xd0   : > { %1465 = vmatmul.mubr.msk.f32.gmra.mrb[2].mxu0 %vm745_vm0, %v664_v31 }
  0xd1   : > { %1019 = vmatprep.mubr.f32.mxu0 %v1923_v2 }
 0x13d   : > { %v676_v36 = vpop.permute.xlu0 %675 }
 0x141   : > { %v681_v51 = vpop.permute.xlu0 %680 }
 0x142   : > { %v688_v19 = vpop.permute.xlu1 %687 }
 0x145   : > { %v700_v47 = vpop.permute.xlu0 %699 }
 0x146   : > { %v693_v31 = vpop.permute.xlu1 %692 }
 0x19f   : > { %v818_v38 = vpop.f32.mrb[0].mxu0 }
 0x1a0   : > { %v819_v39 = vadd.f32 %v818_v38, %v676_v36  ;;  %v820_v41 = vpop.f32.mrb[1].mxu0 }
 0x1a1   : > { %v821_v46 = vadd.f32 %v820_v41, %v676_v36 }
 0x1a2   : > { %v835_v55 = vmul.f32 %v834_v45, %v819_v39  ;;  %v932_v21 = vmul.f32 %v931_v40, %v819_v39 }
 0x1a3   : > { %v933_v52 = vmul.f32 %v931_v40, %v821_v46  ;;  %v824_v53 = vpop.f32.mrb[2].mxu0  ;;  %v836_v60 = vmul.f32 %v834_v45, %v821_v46  ;;  %v1032_v46 = vstv %s1462_s24  ;;  %s1760_s24 = scalar_lea.vmem %s1759_s25, 1024 }
 0x1a4   : > { %v825_v56 = vadd.f32 %v824_v53, %v681_v51  ;;  %v826_v57 = vpop.f32.mrb[3].mxu0  ;;  %v839_v9 = vadd.f32 %v835_v55, %v830_v54  ;;  %v936_v27 = vadd.f32 %v932_v21, %v927_v20  ;;  %v705_v54 = vpop.permute.xlu1 %704 }
 0x1a5   : > { %v937_v61 = vadd.f32 %v933_v52, %v928_v44  ;;  %v827_v62 = vadd.f32 %v826_v57, %v681_v51  ;;  %v840_v1 = vadd.f32 %v836_v60, %v831_v58  ;;  %v667_v44 = vld [vmem:[%s2533_s8] sm:$0xff]  ;;  %v1034_v52 = vmul.f32 %v1032_v46, %v2288_v4 }
 0x1a6   : > { %v837_v0 = vmul.f32 %v834_v45, %v825_v56  ;;  %v934_v29 = vmul.f32 %v931_v40, %v825_v56  ;;  %v1033_v57 = vmul.f32 %v1032_v46, %v2309_v16  ;;  %v1035_v60 = vmul.f32 %v1032_v46, %v2312_v17  ;;  %v669_v17 = vld [vmem:[#allocation10] sm:$0xff] }
 0x1a7   : > { %v838_v3 = vmul.f32 %v834_v45, %v827_v62  ;;  %v935_v6 = vmul.f32 %v931_v40, %v827_v62  ;;  %v668_v45 = vld [vmem:[%s2533_s8 + $0x8] sm:$0xff]  ;;  %v1036_v4 = vmul.f32 %v1032_v46, %v2291_v5  ;;  %v670_v5 = vld [vmem:[#allocation10 + $0x8] sm:$0xff] }
 0x1a8   : > { %v841_v10 = vadd.f32 %v837_v0, %v832_v59  ;;  %v938_v39 = vadd.f32 %v934_v29, %v929_v28 }
 0x1a9   : > { %v939_v11 = vadd.f32 %v935_v6, %v930_v50  ;;  %v842_v12 = vadd.f32 %v838_v3, %v833_v63  ;;  %v1037_v50 = vstv %s1463_s27 }
 0x1aa   : > { %v1495_v13 = vpack.c.bf16 %v841_v10, %v839_v9 }
 0x1ab   : > { %v1493_v14 = vpack.c.bf16 %v842_v12, %v840_v1 }
 0x1ad   : > { %1494 = vmatprep.subr.bf16.mxu1 %v1493_v14 }
 0x1ae   : > { %1496 = vmatpush1.bf16.msra.mxu1 %v1495_v13 }
 0x1b1   : > { %1466 = vmatmul.mubr.msk.f32.vlgmr.msra.gmra.mrb[0].mxu1 %vm745_vm0, %v665_v15 }
 0x1b2   : > { %919 = vmatprep.mubr.f32.mxu1 %v1923_v2 }
 0x1b5   : > { %1467 = vmatmul.mubr.msk.f32.gmra.mrb[2].mxu1 %vm745_vm0, %v666_v18 }
 0x1b6   : > { %1116 = vmatprep.mubr.f32.mxu1 %v1923_v2 }
 0x284   : > { %v915_v22 = vpop.f32.mrb[0].mxu1 }
 0x285   : > { %v916_v24 = vadd.f32 %v915_v22, %v688_v19  ;;  %v917_v25 = vpop.f32.mrb[1].mxu1 }
 0x286   : > { %v918_v26 = vadd.f32 %v917_v25, %v688_v19 }
 0x287   : > { %v941_v30 = vmul.f32 %v940_v23, %v916_v24  ;;  %1129 = vst [vmem:[%s2360_s21] sm:$0xff] %v916_v24 }
 0x288   : > { %v942_v7 = vmul.f32 %v940_v23, %v918_v26  ;;  %1130 = vst [vmem:[%s2360_s21 + $0x8] sm:$0xff] %v918_v26  ;;  %v921_v32 = vpop.f32.mrb[2].mxu1 }
 0x289   : > { %v945_v33 = vadd.f32 %v941_v30, %v936_v27  ;;  %v922_v34 = vadd.f32 %v921_v32, %v693_v31  ;;  %v923_v35 = vpop.f32.mrb[3].mxu1 }
 0x28a   : > { %v946_v36 = vadd.f32 %v942_v7, %v937_v61  ;;  %v924_v38 = vadd.f32 %v923_v35, %v693_v31 }
 0x28b   : > { %v943_v8 = vmul.f32 %v940_v23, %v922_v34  ;;  %1131 = vst [vmem:[%s2360_s21 + $0x10] sm:$0xff] %v922_v34 }
 0x28c   : > { %v944_v37 = vmul.f32 %v940_v23, %v924_v38  ;;  %1132 = vst [vmem:[%s2360_s21 + $0x18] sm:$0xff] %v924_v38  ;;  %s1754_s21 = scalar_lea.vmem %s2393_s2, 512 }
 0x28d   : > { %v947_v40 = vadd.f32 %v943_v8, %v938_v39  ;;  %p1755_p3 = scmp.ne.s32.totalorder %s2393_s2, %s1754_s21  ;;  %p1762_p4 = scmp.lt.s32.totalorder %s1760_s24, %s1754_s21 }
 0x28e   : > { %v948_v41 = vadd.f32 %v944_v37, %v939_v11 }
 0x28f   : > { %v1499_v42 = vpack.c.bf16 %v947_v40, %v945_v33  ;;  %p1756_p7 = pnand %p1755_p3, %p2145_p9  ;;  %p1763_p5 = por %p1762_p4, %p1761_p10 }
 0x290   : > { %v1497_v43 = vpack.c.bf16 %v948_v41, %v946_v36 }
 0x291   : > { %p1757_p11 = pneg %p1756_p7 }
 0x292   : > { %1498 = vmatprep.subr.bf16.mxu0 %v1497_v43 }
 0x293   : > { %1500 = vmatpush1.bf16.msra.mxu0 %v1499_v42  ;;  %p1764_p2 = pnand %p1763_p5, %p1757_p11 }
 0x296   : > { %1468 = vmatmul.mubr.msk.f32.vlgmr.msra.gmra.mrb[4].mxu0 %vm745_vm0, %v667_v44 }
 0x297   : > { %1025 = vmatprep.mubr.f32.mxu0 %v1923_v2 }
 0x29a   : > { %1469 = vmatmul.mubr.msk.f32.gmra.mrb[6].mxu0 %vm745_vm0, %v668_v45 }
 0x369   : > { %v1021_v48 = vpop.f32.mrb[4].mxu0 }
 0x36a   : > { %v1022_v49 = vadd.f32 %v1021_v48, %v700_v47  ;;  %v1023_v51 = vpop.f32.mrb[5].mxu0 }
 0x36b   : > { %v1024_v53 = vadd.f32 %v1023_v51, %v700_v47 }
 0x36c   : > { %1133 = vst [vmem:[%s2377_s14] sm:$0xff] %v1022_v49  ;;  %v1038_v58 = vmul.f32 %v1037_v50, %v1022_v49 }
 0x36d   : > { %v1039_v55 = vmul.f32 %v1037_v50, %v1024_v53  ;;  %1134 = vst [vmem:[%s2377_s14 + $0x8] sm:$0xff] %v1024_v53  ;;  %v1027_v56 = vpop.f32.mrb[6].mxu0 }
 0x36e   : > { %v1028_v59 = vadd.f32 %v1027_v56, %v705_v54  ;;  %v1029_v61 = vpop.f32.mrb[7].mxu0  ;;  %v1042_v6 = vadd.f32 %v1038_v58, %v1033_v57 }
 0x36f   : > { %v1043_v62 = vadd.f32 %v1039_v55, %v1034_v52  ;;  %v1030_v63 = vadd.f32 %v1029_v61, %v705_v54 }
 0x370   : > { %v1040_v0 = vmul.f32 %v1037_v50, %v1028_v59  ;;  %1135 = vst [vmem:[%s2377_s14 + $0x10] sm:$0xff] %v1028_v59 }
 0x371   : > { %v1041_v3 = vmul.f32 %v1037_v50, %v1030_v63  ;;  %1136 = vst [vmem:[%s2377_s14 + $0x18] sm:$0xff] %v1030_v63 }
 0x372   : > { %v1044_v9 = vadd.f32 %v1040_v0, %v1035_v60 }
 0x373   : > { %v1045_v10 = vadd.f32 %v1041_v3, %v1036_v4 }
 0x374   : > { %v1503_v16 = vpack.c.bf16 %v1044_v9, %v1042_v6 }
 0x375   : > { %v1501_v11 = vpack.c.bf16 %v1045_v10, %v1043_v62 }
 0x377   : > { %1502 = vmatprep.subr.bf16.mxu1 %v1501_v11 }
 0x378   : > { %1504 = vmatpush1.bf16.msra.mxu1 %v1503_v16 }
 0x37b   : > { %1470 = vmatmul.mubr.msk.f32.vlgmr.msra.gmra.mrb[4].mxu1 %vm745_vm0, %v669_v17 }
 0x37c   : > { %1122 = vmatprep.mubr.f32.mxu1 %v1923_v2 }
 0x37f   : > { %1471 = vmatmul.mubr.msk.f32.gmra.mrb[6].mxu1 %vm745_vm0, %v670_v5 }
 0x380   : > { %1767 = shalt.err (!%p1764_p2)
}
 0x381   : > { %s1768_s16 = scalar_lea.hbm %s2402_s6, 512  ;;  %s1772_s27 = scalar_lea.hbm %s2594_s12, 1024 }
 0x382   : > { %p1769_p1 = scmp.ne.s32.totalorder %s2402_s6, %s1768_s16  ;;  %p1773_p13 = scmp.lt.u32.totalorder %s2402_s6, %s2594_s12 }
 0x383   : > { %p1774_p0 = scmp.lt.u32.totalorder %s1772_s27, %s1768_s16  ;;  %p1776_p3 = scmp.lt.u32.totalorder %s1768_s16, %s2402_s6 }
 0x384   : > { %p1770_p6 = pnand %p1769_p1, %p2145_p9 }
 0x385   : > { %p1775_p8 = por %p1774_p0, %p1773_p13 }
 0x386   : > { %p1771_p12 = pneg %p1770_p6 }
 0x387   : > { %p1777_p7 = por %p1776_p3, %p1775_p8 }
 0x389   : > { %p1778_p11 = pnand %p1777_p7, %p1771_p12 }
 0x38b   : > { %1781 = shalt.err (!%p1778_p11)
}
 0x38c   : > { %s1926_s0 = smov 256   ;;  %s1927_s21 = smov 16  }
 0x38d   : > { %1522 = dma.vmem_to_hbm [thread:$0]  (%p2145_p9), %s2393_s2, 512, %s2402_s6, %s2406_s26, %s1926_s0, %s1926_s0, %s1927_s21  }
 0x38e   : > { %s2595_s24 = sld [smem:[#allocation33_spill]]  ;;  %s1142_s19 = scalar_lea.sflag [#allocation4], %s2253_s29 }
 0x38f   : > { %s1782_s15 = scalar_lea.vmem %s2391_s10, 512  ;;  %s1928_s27 = smov [#allocation12]  }
 0x390   : > { %p1783_p10 = scmp.ne.s32.totalorder %s2391_s10, %s1782_s15  ;;  %s1786_s14 = sshll.u32 %s1928_s27, 4  ;;  %s1787_s14 = int_to_ptr.vmem [resolvable:$false] %s1786_s14 }
 0x391   : > { %s1788_s20 = scalar_lea.vmem %s1787_s14, 1024  ;;  %p1789_p2 = scmp.lt.s32.totalorder %s2391_s10, %s1787_s14 }
 0x392   : > { %p1784_p4 = pnand %p1783_p10, %p2145_p9  ;;  %p1790_p1 = scmp.lt.s32.totalorder %s1788_s20, %s1782_s15 }
 0x394   : > { %s2437_s16 = scalar_lea.hbm %s2595_s24, %s2396_s23  ;;  %p1785_p5 = pneg %p1784_p4 }
 0x395   : > { %p1791_p6 = por %p1790_p1, %p1789_p2 }
 0x397   : > { %p1792_p12 = pnand %p1791_p6, %p1785_p5 }
 0x399   : > { %1795 = shalt.err (!%p1792_p12)
}
 0x39a   : > { %s1796_s2 = scalar_lea.hbm %s2437_s16, 512  ;;  %s1800_s25 = scalar_lea.hbm %s2595_s24, 1024 }
 0x39b   : > { %p1797_p13 = scmp.ne.s32.totalorder %s2437_s16, %s1796_s2  ;;  %p1801_p3 = scmp.lt.u32.totalorder %s2437_s16, %s2595_s24 }
 0x39c   : > { %p1802_p7 = scmp.lt.u32.totalorder %s1800_s25, %s1796_s2  ;;  %p1804_p10 = scmp.lt.u32.totalorder %s1796_s2, %s2437_s16 }
 0x39d   : > { %p1798_p0 = pnand %p1797_p13, %p2145_p9 }
 0x39e   : > { %p1803_p11 = por %p1802_p7, %p1801_p3 }
 0x39f   : > { %p1799_p8 = pneg %p1798_p0 }
 0x3a0   : > { %p1805_p4 = por %p1804_p10, %p1803_p11 }
 0x3a2   : > { %p1806_p5 = pnand %p1805_p4, %p1799_p8 }
 0x3a4   : > { %1809 = shalt.err (!%p1806_p5)
}
 0x3a5   : > { %1521 = dma.vmem_to_hbm [thread:$0]  (%p2145_p9), %s2391_s10, 512, %s2437_s16, %s1142_s19, %s1926_s0, %s1926_s0, %s1927_s21   ;;  %v712_v2 = vpop.permute.xlu0 %711  ;;  %v717_v15 = vpop.permute.xlu1 %716 }
 0x3a6   : > { %s638_s15 = scalar_lea.vmem [#allocation15], %s2256_s22  ;;  %s2596_s16 = sld [smem:[#allocation35_spill]] }
 0x3a7   : > { %s1203_s20 = sshll.u32 %s638_s15, 4  ;;  %s1929_s6 = smov [#allocation15]   ;;  %s2467_s20 = int_to_ptr.vmem [resolvable:$true] %s1203_s20 }
 0x3a8   : > { %s1810_s22 = scalar_lea.vmem %s2467_s20, 512  ;;  %s1814_s28 = sshll.u32 %s1929_s6, 4  ;;  %s1815_s28 = int_to_ptr.vmem [resolvable:$false] %s1814_s28 }
 0x3a9   : > { %p1811_p2 = scmp.ne.s32.totalorder %s2467_s20, %s1810_s22  ;;  %s1816_s25 = scalar_lea.vmem %s1815_s28, 1024 }
 0x3aa   : > { %p1817_p12 = scmp.lt.s32.totalorder %s2467_s20, %s1815_s28  ;;  %p1818_p13 = scmp.lt.s32.totalorder %s1816_s25, %s1810_s22 }
 0x3ab   : > { %p1812_p1 = pnand %p1811_p2, %p2145_p9 }
 0x3ac   : > { %s2597_s19 = smov %s2596_s16  ;;  %s2473_s2 = scalar_lea.hbm %s2596_s16, %s2396_s23 }
 0x3ad   : > { %p1813_p6 = pneg %p1812_p1  ;;  %p1819_p0 = por %p1818_p13, %p1817_p12 }
 0x3af   : > { %p1820_p8 = pnand %p1819_p0, %p1813_p6 }
 0x44e   : > { %v1118_v1 = vpop.f32.mrb[4].mxu1 }
 0x44f   : > { %v1119_v12 = vadd.f32 %v1118_v1, %v712_v2  ;;  %v1120_v13 = vpop.f32.mrb[5].mxu1 }
 0x450   : > { %v1121_v14 = vadd.f32 %v1120_v13, %v712_v2 }
 0x451   : > { %1137 = vst [vmem:[%s638_s15] sm:$0xff] %v1119_v12 }
 0x452   : > { %1138 = vst [vmem:[%s638_s15 + $0x8] sm:$0xff] %v1121_v14  ;;  %v1124_v18 = vpop.f32.mrb[6].mxu1 }
 0x453   : > { %v1125_v19 = vadd.f32 %v1124_v18, %v717_v15  ;;  %v1126_v20 = vpop.f32.mrb[7].mxu1 }
 0x454   : > { %v1127_v21 = vadd.f32 %v1126_v20, %v717_v15 }
 0x455   : > { %1139 = vst [vmem:[%s638_s15 + $0x10] sm:$0xff] %v1125_v19 }
 0x456   : > { %1140 = vst [vmem:[%s638_s15 + $0x18] sm:$0xff] %v1127_v21 }
 0x457   : > { %1823 = shalt.err (!%p1820_p8)
}
 0x458   : > { %s1824_s23 = scalar_lea.hbm %s2473_s2, 512  ;;  %s1828_s15 = scalar_lea.hbm %s2597_s19, 1024 }
 0x459   : > { %p1825_p3 = scmp.ne.s32.totalorder %s2473_s2, %s1824_s23  ;;  %p1829_p10 = scmp.lt.u32.totalorder %s2473_s2, %s2597_s19 }
 0x45a   : > { %p1830_p4 = scmp.lt.u32.totalorder %s1828_s15, %s1824_s23  ;;  %p1832_p2 = scmp.lt.u32.totalorder %s1824_s23, %s2473_s2 }
 0x45b   : > { %p1826_p7 = pnand %p1825_p3, %p2145_p9 }
 0x45c   : > { %p1831_p5 = por %p1830_p4, %p1829_p10 }
 0x45d   : > { %p1827_p11 = pneg %p1826_p7 }
 0x45e   : > { %p1833_p1 = por %p1832_p2, %p1831_p5 }
 0x460   : > { %p1834_p6 = pnand %p1833_p1, %p1827_p11 }
 0x462   : > { %1837 = shalt.err (!%p1834_p6)
}
 0x463   : > { %1523 = dma.vmem_to_hbm [thread:$0]  (%p2145_p9), %s2467_s20, 512, %s2473_s2, %s2406_s26, %s1926_s0, %s1926_s0, %s1927_s21  }
 0x464 PF: > { %s2598_s16 = sld [smem:[#allocation23_spill]]  ;;  %s2599_s22 = sld [smem:[#allocation25_spill]] }
 0x465   : > { %p2601_p13 = scmp.ge.s32.totalorder %s1912_s18, 2 }
 0x46a   : > { %s1218_s6 = sand.u32 1, %s2598_s16   ;;  %p2600_p12 = scmp.ne.s32.totalorder %s2599_s22, 0 }
 0x46b   : > { %s1219_s28 = scalar_lea.sflag [#allocation4], %s1218_s6 }
 0x46c   : > { %p1545_p0 = pnand %p2601_p13, %p2600_p12 }
 0x46e   : > { %1883 = dma.done.wait (!%p1545_p0), %s1219_s28, 512  }
 0x46f   : > { %1885 = vsyncadd (!%p1545_p0), %s1219_s28, 4294966784  ;;  %s2602_s13 = sadd.s32 4294967294, %s1912_s18  }
 0x470   : > { %s1227_s25 = sand.u32 1, %s2602_s13  }
 0x471   : > { %s1228_s23 = scalar_lea.sflag [#allocation14], %s1227_s25 }
 0x472   : > { %1887 = dma.done.wait (!%p1545_p0), %s1228_s23, 1024  }
 0x473   : > { %1889 = vsyncadd (!%p1545_p0), %s1228_s23, 4294966272  ;;  %s39_s18 = sadd.s32 1, %s1912_s18   ;;  %s2603_s26 = sld [smem:[#allocation24_spill]] }
 0x474   : > { %p36_p9 = scmp.ge.s32.totalorder %s39_s18, 4   ;;  %s2604_s15 = sld [smem:[#allocation28_spill]] }
 0x475   : > { %s2605_s0 = sld [smem:[#allocation26_spill]]  ;;  %s2606_s29 = smov %s1896_s30 }
 0x476   : > { %s2608_s16 = smov %s1908_s17  ;;  %38 = sbr.rel (!%p36_p9) target bundleno = 20 (0x14), region = 174 }
 0x479   : > { %s2607_s30 = smov %s2603_s26 }
 0x47b   : > { %s2609_s17 = smov %s2605_s0 }
 0x47d   :  { %1242 = vsyncpa [#allocation3], 1 }
 0x47e   :  { %1244 = vsyncpa [#allocation3 + $0x1], 1 }
 0x47f   :  { %1245 = vsyncpa [#allocation8], 1 }
 0x480   :  { %1247 = vsyncpa [#allocation8 + $0x1], 1 }
 0x481   :  { %1248 = vsyncpa [#allocation11], 1 }
 0x482   :  { %1249 = vsyncpa [#allocation4], 1 }
 0x483   :  { %1251 = vsyncpa [#allocation4 + $0x1], 1 }
 0x484   :  { %1252 = vsyncpa [#allocation14], 1 }
 0x485   :  { %1254 = vsyncpa [#allocation14 + $0x1], 1 }
 0x486   :  { %1255 = vsyncpa [#allocation5], 1 }
 0x487   :  { %1257 = vsyncpa [#allocation5 + $0x1], 1 }

</bundles_post_ra>
